<compile_context>
chip_gen: v7x
topology: tpu7x:2x2x1
jax: 0.10.0
libtpu: 0.0.40
codegen_flags: <defaults>
</compile_context>

<pallas_src>
import jax
import jax.numpy as jnp
from jax.experimental import pallas as pl
from jax.experimental.pallas import tpu as pltpu

EPS = 1e-5  # PyTorch InstanceNorm2d default (affine=False, biased variance)


def _gen_encoder_kernel(p_ref, w_ref, o_ref):
    # p_ref: (1, K, P) bf16   w_ref: (tn, K) bf16   o_ref: (1, tn, P) f32
    patches = p_ref[0]                       # (K, P)
    w = w_ref[...]                           # (tn, K)

    # Conv2d as GEMM on the MXU (bf16 in, f32 accumulate), lane-dense output.
    y = jnp.dot(w, patches, preferred_element_type=jnp.float32)   # (tn, P)

    # InstanceNorm2d: per-channel mean / biased variance over spatial P
    # (lane-axis XLU reduction).  Keep (y - mean) once; fuse normalize + LeakyReLU.
    inv_p = 1.0 / y.shape[-1]
    mean = jnp.sum(y, axis=-1, keepdims=True) * inv_p             # (tn, 1)
    d = y - mean
    var = jnp.sum(d * d, axis=-1, keepdims=True) * inv_p          # biased var
    y_n = d * jax.lax.rsqrt(var + EPS)

    # LeakyReLU(0.2)
    o_ref[0] = jnp.where(y_n > 0, y_n, 0.2 * y_n).astype(o_ref.dtype)


def _im2col_kp(x, kh=4, kw=4, stride=2, pad=1):
    # x: (N, C, H, W) -> patches (N, C*kh*kw, OH*OW); K ordered (C, kh, kw)
    n, c, h, w = x.shape
    oh = (h + 2 * pad - kh) // stride + 1
    ow = (w + 2 * pad - kw) // stride + 1
    x_pad = jnp.pad(x, ((0, 0), (0, 0), (pad, pad), (pad, pad)))
    slices = []
    for i in range(kh):
        for j in range(kw):
            s = x_pad[:, :, i:i + stride * oh:stride, j:j + stride * ow:stride]
            slices.append(s)                         # (N, C, OH, OW)
    stk = jnp.stack(slices, axis=2)                  # (N, C, kh*kw, OH, OW)
    patches = stk.reshape(n, c * kh * kw, oh * ow)   # (N, K, P)
    return patches, oh, ow


def _pick_cout_tile(c_out):
    # Full C_out when small; otherwise the largest MXU-friendly tile that divides it.
    if c_out <= 256:
        return c_out
    for t in (256, 128, 64, 32, 16, 8):
        if c_out % t == 0:
            return t
    return c_out


def gen_encoder_block(x, weight):
    """x: (N, C_in, H, W) float32, weight: (C_out, C_in, 4, 4) float32.
    Returns (N, C_out, H//2, W//2) float32, matching the PyTorch module."""
    n, c_in, h, w = x.shape
    c_out = weight.shape[0]

    patches, oh, ow = _im2col_kp(x)                  # (N, K, P)
    p_dim = oh * ow
    k_dim = c_in * 16
    w_mat = weight.reshape(c_out, k_dim)             # (C_out, K)

    # bf16 inputs; f32 accumulation inside the kernel.
    patches = patches.astype(jnp.bfloat16)
    w_mat = w_mat.astype(jnp.bfloat16)

    tn = _pick_cout_tile(c_out)
    n_ct = c_out // tn

    out = pl.pallas_call(
        _gen_encoder_kernel,
        out_shape=jax.ShapeDtypeStruct((n, c_out, p_dim), jnp.float32),
        grid_spec=pltpu.PrefetchScalarGridSpec(
            num_scalar_prefetch=0,
            grid=(n, n_ct),
            in_specs=[
                pl.BlockSpec((1, k_dim, p_dim), lambda b, j: (b, 0, 0)),
                pl.BlockSpec((tn, k_dim), lambda b, j: (j, 0)),
            ],
            out_specs=pl.BlockSpec((1, tn, p_dim), lambda b, j: (b, j, 0)),
        ),
        compiler_params=pltpu.CompilerParams(
            dimension_semantics=("parallel", "parallel"),
            vmem_limit_bytes=48 * 1024 * 1024,
        ),
    )(patches, w_mat)

    # (N, C_out, P) -> (N, C_out, OH, OW): pure reshape, no transpose needed.
    return out.reshape(n, c_out, oh, ow)


def _reference(x, weight):
    # Pure-JAX f32 reference for correctness checking.
    y = jax.lax.conv_general_dilated(
        x, weight, window_strides=(2, 2), padding=((1, 1), (1, 1)),
        dimension_numbers=("NCHW", "OIHW", "NCHW"))
    mean = jnp.mean(y, axis=(2, 3), keepdims=True)
    var = jnp.mean((y - mean) ** 2, axis=(2, 3), keepdims=True)
    y = (y - mean) * jax.lax.rsqrt(var + EPS)
    return jnp.where(y > 0, y, 0.2 * y)


if __name__ == "__main__":
    key = jax.random.PRNGKey(0)
    k_x, k_w = jax.random.split(key)

    N, C_IN, C_OUT, H, W = 2, 4, 8, 16, 16
    x = jax.random.normal(k_x, (N, C_IN, H, W), dtype=jnp.float32)
    # Deterministic "kaiming-ish" conv weight init (Conv2d has bias=False)
    fan_in = C_IN * 4 * 4
    weight = jax.random.normal(k_w, (C_OUT, C_IN, 4, 4), dtype=jnp.float32)
    weight = weight * (2.0 / fan_in) ** 0.5

    out = gen_encoder_block(x, weight)
    out = jax.block_until_ready(out)

    ref = _reference(x, weight)
    assert out.shape == (N, C_OUT, H // 2, W // 2)
    # Tolerance loosened vs the pure-f32 version: inputs are bf16 (accumulation
    # stays f32), so expect ~1e-3..1e-2 absolute error on unit-variance outputs.
    assert jnp.allclose(out, ref, atol=3e-2, rtol=3e-2), "mismatch vs reference"

    print("KERNEL_OK")
</pallas_src>

<mosaic_0001>
module attributes {stable_mosaic.version = 11 : i64} {
  func.func @_gen_encoder_kernel(%arg0: i32, %arg1: i32, %arg2: memref<1x64x64xbf16, #tpu.memory_space<vmem>>, %arg3: memref<8x64xbf16, #tpu.memory_space<vmem>>, %arg4: memref<1x8x64xf32, #tpu.memory_space<vmem>>) attributes {dimension_semantics = [#tpu.dimension_semantics<parallel>, #tpu.dimension_semantics<parallel>], iteration_bounds = array<i64: 2, 1>, scalar_prefetch = 0 : i64, scratch_operands = 0 : i64, tpu.core_type = #tpu.core_type<tc>, window_params = [{transform_indices = @transform_0, window_bounds = array<i64: 1, 64, 64>}, {transform_indices = @transform_1, window_bounds = array<i64: 8, 64>}, {transform_indices = @transform_2, window_bounds = array<i64: 1, 8, 64>}]} {
    %c0 = arith.constant 0 : index
    %c0_0 = arith.constant 0 : index
    %c0_1 = arith.constant 0 : index
    %0 = vector.load %arg2[%c0, %c0_0, %c0_1] : memref<1x64x64xbf16, #tpu.memory_space<vmem>>, vector<1x64x64xbf16>
    %1 = vector.shape_cast %0 : vector<1x64x64xbf16> to vector<64x64xbf16>
    %c0_2 = arith.constant 0 : index
    %c0_3 = arith.constant 0 : index
    %2 = vector.load %arg3[%c0_2, %c0_3] : memref<8x64xbf16, #tpu.memory_space<vmem>>, vector<8x64xbf16>
    %cst = arith.constant dense<0.000000e+00> : vector<8x64xf32>
    %3 = tpu.matmul %2, %1, %cst {dimension_numbers = #tpu.dot_dimension_numbers<[1], [0], [0], [1], [0, 0, 1, 1], [], []>} : vector<8x64xbf16>, vector<64x64xbf16>, vector<8x64xf32> -> vector<8x64xf32>
    %cst_4 = arith.constant dense<0.000000e+00> : vector<8xf32>
    %4 = vector.multi_reduction <add>, %3, %cst_4 [1] : vector<8x64xf32> to vector<8xf32>
    %5 = vector.shape_cast %4 : vector<8xf32> to vector<8x1xf32>
    %cst_5 = arith.constant 1.562500e-02 : f32
    %6 = vector.broadcast %cst_5 : f32 to vector<8x1xf32>
    %7 = arith.mulf %5, %6 : vector<8x1xf32>
    %8 = vector.broadcast %7 : vector<8x1xf32> to vector<8x64xf32>
    %9 = arith.subf %3, %8 : vector<8x64xf32>
    %10 = arith.mulf %9, %9 : vector<8x64xf32>
    %cst_6 = arith.constant dense<0.000000e+00> : vector<8xf32>
    %11 = vector.multi_reduction <add>, %10, %cst_6 [1] : vector<8x64xf32> to vector<8xf32>
    %12 = vector.shape_cast %11 : vector<8xf32> to vector<8x1xf32>
    %cst_7 = arith.constant 1.562500e-02 : f32
    %13 = vector.broadcast %cst_7 : f32 to vector<8x1xf32>
    %14 = arith.mulf %12, %13 : vector<8x1xf32>
    %cst_8 = arith.constant 9.99999974E-6 : f32
    %15 = vector.broadcast %cst_8 : f32 to vector<8x1xf32>
    %16 = arith.addf %14, %15 : vector<8x1xf32>
    %17 = math.rsqrt %16 : vector<8x1xf32>
    %18 = vector.broadcast %17 : vector<8x1xf32> to vector<8x64xf32>
    %19 = arith.mulf %9, %18 : vector<8x64xf32>
    %cst_9 = arith.constant 0.000000e+00 : f32
    %20 = vector.broadcast %cst_9 : f32 to vector<8x64xf32>
    %21 = arith.cmpf ogt, %19, %20 : vector<8x64xf32>
    %cst_10 = arith.constant 2.000000e-01 : f32
    %22 = vector.broadcast %cst_10 : f32 to vector<8x64xf32>
    %23 = arith.mulf %22, %19 : vector<8x64xf32>
    %24 = arith.select %21, %19, %23 : vector<8x64xi1>, vector<8x64xf32>
    %c0_11 = arith.constant 0 : index
    %c0_12 = arith.constant 0 : index
    %c0_13 = arith.constant 0 : index
    %25 = vector.load %arg4[%c0_11, %c0_12, %c0_13] : memref<1x8x64xf32, #tpu.memory_space<vmem>>, vector<1x8x64xf32>
    %26 = vector.shape_cast %25 : vector<1x8x64xf32> to vector<8x64xf32>
    %27 = vector.shape_cast %24 : vector<8x64xf32> to vector<1x8x64xf32>
    tpu.vector_store %arg4[%c0_11, %c0_12, %c0_13], %27 {strides = array<i32>} : memref<1x8x64xf32, #tpu.memory_space<vmem>>, vector<1x8x64xf32>,
    return
  }
  func.func @transform_0(%arg0: i32, %arg1: i32) -> (i32, i32, i32) {
    %c0_i32 = arith.constant 0 : i32
    %c0_i32_0 = arith.constant 0 : i32
    %c0_i32_1 = arith.constant 0 : i32
    return %arg0, %c0_i32, %c0_i32_0 : i32, i32, i32
  }
  func.func @transform_1(%arg0: i32, %arg1: i32) -> (i32, i32) {
    %c0_i32 = arith.constant 0 : i32
    %c0_i32_0 = arith.constant 0 : i32
    return %arg1, %c0_i32 : i32, i32
  }
  func.func @transform_2(%arg0: i32, %arg1: i32) -> (i32, i32, i32) {
    %c0_i32 = arith.constant 0 : i32
    %c0_i32_0 = arith.constant 0 : i32
    return %arg0, %arg1, %c0_i32 : i32, i32, i32
  }
}

</mosaic_0001>

<bundles_post_ra>
// kernel: tpu_custom_call.1
= control target key start
LH: loop header
LB: loop body
LE: loop exit
PB: predicated region body
PF: predicated region fallthrough
CT: control target
= control target key end

     0   :  { %7 = vsyncpa [#allocation3], 0  ;;  %s911_s0 = inlined_call_operand.hbm [shape: bf16[2,64,64], index: 0, kind: input, shape index: {}]   ;;  %s912_s1 = inlined_call_operand.hbm [shape: bf16[8,64], index: 1, kind: input, shape index: {}]   ;;  %s913_s2 = inlined_call_operand.hbm [shape: f32[2,8,64], index: 2, kind: output, shape index: {}]  }
   0x1   :  { %9 = vsyncpa [#allocation3 + $0x1], 0 }
   0x2   :  { %10 = vsyncpa [#allocation6], 0 }
   0x3   :  { %11 = vsyncpa [#allocation4], 0 }
   0x4   :  { %13 = vsyncpa [#allocation4 + $0x1], 0  ;;  %s687_s9 = smov 0   ;;  %s689_s10 = smov 0  }
   0x5   :  { %s691_s11 = smov 0   ;;  %s693_s12 = smov 0  }
   0x6   :  { %s695_s13 = smov 0   ;;  %s697_s14 = smov 0  }
   0x7 LB: > { %s397_s15 = sadd.s32 4294967295, %s663_s14   ;;  %s398_s16 = sadd.s32 4294967294, %s663_s14   ;;  %s663_s14 = sphi %s697_s14, %s19_s14   ;;  %s659_s13 = sphi %s695_s13, %s941_s13   ;;  %s655_s12 = sphi %s693_s12, %s940_s12   ;;  %s651_s11 = sphi %s691_s11, %s939_s11   ;;  %s647_s10 = sphi %s689_s10, %s938_s10   ;;  %s643_s9 = sphi %s687_s9, %s937_s9  }
   0x8   : > { %s38_s17 = sadd.s32 1, %s651_s11  ;;  %p45_p0 = scmp.ne.s32.totalorder %s651_s11, %s647_s10 }
   0x9   : > { %p46_p1 = scmp.eq.s32.totalorder %s663_s14, 0  ;;  %p51_p2 = scmp.ne.s32.totalorder %s647_s10, %s643_s9 }
   0xa   : > { %p725_p3 = scmp.eq.s32.totalorder %s397_s15, 0  ;;  %p103_p4 = scmp.eq.s32.totalorder %s397_s15, 1 }
   0xb   : > { %p729_p5 = por %p46_p1, %p45_p0  ;;  %p109_p6 = scmp.eq.s32.totalorder %s398_s16, 1 }
   0xc   : > { %s920_s18 = scalar_select %p725_p3, 1, 0 }
   0xd   : > { %p735_p7 = por %p725_p3, %p51_p2  ;;  %p739_p8 = por %p103_p4, %p45_p0 }
   0xe   : > { %p743_p9 = por %p109_p6, %p51_p2  ;;  %p399_p10 = scmp.ge.s32.totalorder %s663_s14, 1 }
   0xf   : > { %s922_s20 = scalar_select %p735_p7, 1, 0 }
  0x10   : > { %s923_s21 = scalar_select %p739_p8, 1, 0 }
  0x11   : > { %s924_s22 = scalar_select %p743_p9, 1, 0 }
  0x12   : > { %p116_p11 = scmp.lt.s32.totalorder %s663_s14, 3  ;;  %s665_s24 = smov [#allocation5]  }
  0x13   : > { %s131_s25 = sshll.u32 %s665_s24, 4  ;;  %p457_p1 = scmp.lt.s32.totalorder %s663_s14, 2  ;;  %s132_s25 = int_to_ptr.vmem [resolvable:$true] %s131_s25 }
  0x14   : > { %p750_p13 = pnand %p399_p10, %p116_p11  ;;  %s31_s28 = sadd.s32 1, %s659_s13 }
  0x15   : > { %p759_p4 = pnand %p457_p1, %p729_p5  ;;  %p770_p6 = scmp.ge.s32.totalorder %s31_s28, 2 }
  0x16   : > { %s925_s23 = scalar_select %p750_p13, 1, 0 }
  0x17   : > { %p444_p0 = pneg %p750_p13  ;;  %s142_s30 = sand.u32 1, %s651_s11  }
  0x18   : > { %s926_s26 = scalar_select %p759_p4, 1, 0 }
  0x19   : > { %p765_p2 = pnand %p444_p0, %p725_p3  ;;  %s519_s5 = scalar_lea.hbm %s912_s1, 64 }
  0x1a   : > { %s928_s29 = scalar_select %p770_p6, 1, 0 }
  0x1b   : > { %p520_p5 = scmp.ne.s32.totalorder %s912_s1, %s519_s5  ;;  %p521_p10 = pneg %p765_p2 }
  0x1c   : > { %p526_p0 = scmp.lt.u32.totalorder %s519_s5, %s912_s1 }
  0x1d   : > { %p522_p11 = pnand %p521_p10, %p520_p5 }
  0x1f   : > { %p523_p1 = pneg %p522_p11 }
  0x21   : > { %p528_p12 = pnand %p526_p0, %p523_p1 }
  0x23   : > { %531 = shalt.err (!%p528_p12)
}
  0x24   : > { %s532_s16 = scalar_lea.vmem %s132_s25, 64  ;;  %p540_p7 = scmp.lt.s32.totalorder %s132_s25, %s132_s25 }
  0x25   : > { %p533_p9 = scmp.ne.s32.totalorder %s132_s25, %s532_s16  ;;  %p541_p13 = scmp.lt.s32.totalorder %s532_s16, %s532_s16 }
  0x27   : > { %p535_p8 = pnand %p533_p9, %p521_p10  ;;  %p542_p4 = por %p541_p13, %p540_p7 }
  0x29   : > { %p536_p3 = pneg %p535_p8 }
  0x2b   : > { %p543_p6 = pnand %p542_p4, %p536_p3 }
  0x2d   : > { %546 = shalt.err (!%p543_p6)
}
  0x2e   : > { %447 = dma.hbm_to_vmem [thread:$0]  (!%p765_p2), %s912_s1, 64, %s132_s25, [#allocation6]  }
  0x2f   : > { %p929_p9 = scmp.ne.s32.totalorder %s928_s29, 0  ;;  %s402_s3 = sshll.u32 %s142_s30, 5 }
  0x30   : > { %s418_s5 = sshll.u32 %s659_s13, 9  ;;  %s146_s8 = scalar_lea.vmem [#allocation2], %s402_s3 }
  0x31   : > { %s943_s28 = smov (%p929_p9, %s31_s28), 0  ;;  %s801_s7 = scalar_lea.hbm %s911_s0, %s418_s5 }
  0x32   : > { %s35_s4 = ssub.s32 %s659_s13, %s943_s28  ;;  %s153_s15 = sshll.u32 %s146_s8, 4  ;;  %s808_s15 = int_to_ptr.vmem [resolvable:$true] %s153_s15 }
  0x33   : > { %p36_p3 = scmp.eq.s32.totalorder %s35_s4, 0  ;;  %s810_s29 = scalar_lea.sflag [#allocation3], %s142_s30 }
  0x34   : > { %s547_s16 = scalar_lea.hbm %s801_s7, 512  ;;  %p930_p8 = scmp.ne.s32.totalorder %s926_s26, 0 }
  0x35   : > { %s806_s25 = scalar_select %p36_p3, %s651_s11, %s38_s17  }
  0x36   : > { %p548_p7 = scmp.ne.s32.totalorder %s801_s7, %s547_s16  ;;  %p549_p12 = pneg %p930_p8 }
  0x37   : > { %s552_s3 = scalar_lea.hbm %s911_s0, 1024  ;;  %p553_p2 = scmp.lt.u32.totalorder %s801_s7, %s911_s0 }
  0x38   : > { %p550_p13 = pnand %p549_p12, %p548_p7  ;;  %p554_p6 = scmp.lt.u32.totalorder %s552_s3, %s547_s16 }
  0x39   : > { %p556_p10 = scmp.lt.u32.totalorder %s547_s16, %s801_s7 }
  0x3a   : > { %p551_p4 = pneg %p550_p13  ;;  %p555_p5 = por %p554_p6, %p553_p2 }
  0x3c   : > { %p557_p11 = por %p556_p10, %p555_p5 }
  0x3e   : > { %p558_p1 = pnand %p557_p11, %p551_p4 }
  0x40   : > { %561 = shalt.err (!%p558_p1)
}
  0x41   : > { %s562_s17 = scalar_lea.vmem %s808_s15, 512  ;;  %s666_s30 = smov [#allocation2]  }
  0x42   : > { %p563_p0 = scmp.ne.s32.totalorder %s808_s15, %s562_s17  ;;  %s567_s27 = sshll.u32 %s666_s30, 4  ;;  %s568_s27 = int_to_ptr.vmem [resolvable:$false] %s567_s27 }
  0x43   : > { %s569_s6 = scalar_lea.vmem %s568_s27, 1024  ;;  %p570_p7 = scmp.lt.s32.totalorder %s808_s15, %s568_s27 }
  0x44   : > { %p565_p9 = pnand %p563_p0, %p549_p12  ;;  %p571_p13 = scmp.lt.s32.totalorder %s569_s6, %s562_s17 }
  0x46   : > { %p566_p3 = pneg %p565_p9  ;;  %p572_p2 = por %p571_p13, %p570_p7 }
  0x48   : > { %p573_p6 = pnand %p572_p2, %p566_p3 }
  0x4a   : > { %576 = shalt.err (!%p573_p6)
}
  0x4b   : > { %s667_s8 = smov 64   ;;  %s668_s16 = smov 4  }
  0x4c   : > { %451 = dma.hbm_to_vmem [thread:$0]  (!%p930_p8), %s801_s7, 512, %s808_s15, %s810_s29, %s667_s8, %s667_s8, %s668_s16  }
  0x4d   : > { %p931_p12 = scmp.ne.s32.totalorder %s925_s23, 0 }
  0x4e   : > { %s841_s19 = sand.u32 (!%p931_p12), 1, %s647_s10   ;;  %p932_p4 = scmp.ne.s32.totalorder (!%p931_p12), %s922_s20, 0 }
  0x4f   : > { %165 = sbr.rel (%p931_p12) target bundleno = 645 (0x285), region = 28  ;;  %s406_s24 = sshll.u32 (!%p931_p12), %s841_s19, 5 }
  0x50   : > { %s168_s3 = scalar_lea.sflag (!%p931_p12), [#allocation3], %s841_s19  ;;  %s171_s4 = scalar_lea.vmem (!%p931_p12), [#allocation2], %s406_s24 }
  0x56   : > { %630 = dma.done.wait (%p932_p4), %s168_s3, 512  }
  0x57   : > { %632 = vsyncadd (%p932_p4), %s168_s3, 4294966784  ;;  %p933_p5 = scmp.ne.s32.totalorder %s920_s18, 0 }
  0x59   : > { %634 = dma.done.wait (%p933_p5), [#allocation6], 64  }
  0x5a   : > { %636 = vsyncadd (%p933_p5), [#allocation6], 4294967232  ;;  %v669_v0 = vmov 0.0   ;;  %vm670_vm0 = vmmov 0   ;;  %v513_v1 = vld [vmem:[%s171_s4] sm:$0xff]   ;;  %v514_v2 = vld [vmem:[%s171_s4 + $0x8] sm:$0xff]  }
  0x5b   : > { %424 = vmatprep.subr.bf16.mxu0 %v669_v0  ;;  %432 = vmatprep.mubr.msk.bf16.mxu0 %vm670_vm0, %v669_v0  ;;  %v515_v3 = vld [vmem:[%s171_s4 + $0x10] sm:$0xff]   ;;  %v516_v4 = vld [vmem:[%s171_s4 + $0x18] sm:$0xff]   ;;  %v205_v5 = vld [vmem:[#allocation5] sm:$0xf]  ;;  %vm230_vm1 = vcmask 523264   ;;  %s408_s18 = sshll.u32 %s841_s19, 3 }
  0x5c   : > { %425 = vmatpush3.bf16.msra.mxu0 %v513_v1  ;;  %s415_s20 = sshll.u32 %s655_s12, 7  ;;  %s195_s23 = scalar_lea.vmem [#allocation7], %s408_s18 }
  0x5d   : > { %426 = vmatprep.subr.bf16.mxu0 %v669_v0  ;;  %s306_s26 = sshll.u32 %s195_s23, 4  ;;  %s861_s29 = scalar_lea.hbm %s913_s2, %s415_s20  ;;  %s863_s26 = int_to_ptr.vmem [resolvable:$true] %s306_s26 }
  0x5e   : > { %s292_s5 = scalar_lea.sflag [#allocation4], %s841_s19  ;;  %s577_s17 = scalar_lea.vmem %s863_s26, 128 }
  0x5f   : > { %p578_p8 = scmp.ne.s32.totalorder %s863_s26, %s577_s17  ;;  %p934_p10 = scmp.ne.s32.totalorder %s923_s21, 0 }
  0x60   : > { %427 = vmatpush3.bf16.msra.mxu0 %v514_v2  ;;  %s671_s12 = smov [#allocation7]  }
  0x61   : > { %428 = vmatprep.subr.bf16.mxu0 %v669_v0  ;;  %p579_p11 = pnand %p578_p8, %p934_p10  ;;  %s581_s30 = sshll.u32 %s671_s12, 4  ;;  %s582_s30 = int_to_ptr.vmem [resolvable:$false] %s581_s30 }
  0x62   : > { %s583_s27 = scalar_lea.vmem %s582_s30, 256  ;;  %p584_p0 = scmp.lt.s32.totalorder %s863_s26, %s582_s30 }
  0x63   : > { %p580_p1 = pneg %p579_p11  ;;  %p585_p9 = scmp.lt.s32.totalorder %s583_s27, %s577_s17 }
  0x64   : > { %429 = vmatpush3.bf16.msra.mxu0 %v515_v3 }
  0x65   : > { %430 = vmatprep.subr.bf16.mxu0 %v669_v0  ;;  %p586_p3 = por %p585_p9, %p584_p0 }
  0x67   : > { %p587_p7 = pnand %p586_p3, %p580_p1 }
  0x68   : > { %431 = vmatpush3.bf16.msra.mxu0 %v516_v4 }
  0x6b   : > { %433 = vmatmul.mubr.msk.bf16.vlgmr.msra.gmra.mrb[0].mxu0 %vm230_vm1, %v205_v5 }
 0x13e   : > { %v268_v6 = vpop.f32.mrb[0].mxu0 }
 0x13f   : > { %v434_v7 = vpop.f32.mrb[1].mxu0  ;;  %v274_v8 = vsel %vm230_vm1, %v268_v6, 0.0 }
 0x140   : > { %275 = vadd.xlane.f32.xlu0 %v274_v8  ;;  %v271_v9 = vpop.f32.mrb[2].mxu0 }
 0x141   : > { %v435_v10 = vpop.f32.mrb[3].mxu0 }
 0x1cd   : > { %v276_v11 = vpop.xlane.xlu0 %275 }
 0x1ce   : > { %v277_v12 = vmul.f32 0.015625, %v276_v11 }
 0x1d0   : > { %v278_v13 = vsub.f32 %v268_v6, %v277_v12 }
 0x1d2   : > { %v279_v14 = vmul.f32 %v278_v13, %v278_v13 }
 0x1d4   : > { %v280_v15 = vsel %vm230_vm1, %v279_v14, 0.0 }
 0x1d5   : > { %281 = vadd.xlane.f32.xlu0 %v280_v15 }
 0x262   : > { %v282_v16 = vpop.xlane.xlu0 %281 }
 0x263   : > { %v283_v17 = vmul.f32 0.015625, %v282_v16 }
 0x265   : > { %v284_v18 = vadd.f32 1e-05, %v283_v17 }
 0x267   : > { %517 = vrsqrt.f32 %v284_v18 }
 0x271   : > { %v518_v19 = vpop.eup %517 }
 0x272   : > { %v286_v20 = vmul.f32 %v518_v19, %v278_v13 }
 0x274   : > { %vm287_vm2 = vcmp.gt.f32.partialorder %v286_v20, 0.0  ;;  %v288_v21 = vmul.f32 0.2, %v286_v20 }
 0x276   : > { %v289_v22 = vsel %vm287_vm2, %v286_v20, %v288_v21 }
 0x277   : > { %290 = vst.msk [vmem:[%s195_s23] sm:$0xff] %vm230_vm1, %v289_v22 }
 0x278   : > { %590 = shalt.err (!%p587_p7)
}
 0x279   : > { %s591_s6 = scalar_lea.hbm %s861_s29, 128  ;;  %s595_s19 = scalar_lea.hbm %s913_s2, 256 }
 0x27a   : > { %p592_p13 = scmp.ne.s32.totalorder %s861_s29, %s591_s6  ;;  %p596_p12 = scmp.lt.u32.totalorder %s861_s29, %s913_s2 }
 0x27b   : > { %p597_p4 = scmp.lt.u32.totalorder %s595_s19, %s591_s6  ;;  %p599_p8 = scmp.lt.u32.totalorder %s591_s6, %s861_s29 }
 0x27c   : > { %p593_p2 = pnand %p592_p13, %p934_p10 }
 0x27d   : > { %p598_p5 = por %p597_p4, %p596_p12 }
 0x27e   : > { %p594_p6 = pneg %p593_p2 }
 0x27f   : > { %p600_p11 = por %p599_p8, %p598_p5 }
 0x281   : > { %p601_p1 = pnand %p600_p11, %p594_p6 }
 0x283   : > { %604 = shalt.err (!%p601_p1)
}
 0x284   : > { %442 = dma.vmem_to_hbm [thread:$0]  (%p934_p10), %s863_s26, 128, %s861_s29, %s292_s5  }
 0x285 PF: > { %s318_s4 = sand.u32 1, %s643_s9   ;;  %p935_p0 = scmp.ne.s32.totalorder %s924_s22, 0 }
 0x286   : > { %p936_p9 = scmp.ge.s32.totalorder %s663_s14, 2  ;;  %s319_s18 = scalar_lea.sflag [#allocation4], %s318_s4 }
 0x288   : > { %p453_p3 = pnand %p936_p9, %p935_p0 }
 0x28a   : > { %638 = dma.done.wait (!%p453_p3), %s319_s18, 128  }
 0x28b   : > { %640 = vsyncadd (!%p453_p3), %s319_s18, 4294967168  ;;  %s19_s14 = sadd.s32 1, %s663_s14   ;;  %s937_s9 = smov %s647_s10 }
 0x28c   : > { %p16_p7 = scmp.ge.s32.totalorder %s19_s14, 4   ;;  %s938_s10 = smov %s651_s11 }
 0x28d   : > { %s939_s11 = smov %s806_s25  ;;  %s940_s12 = smov %s659_s13 }
 0x28e   : > { %s941_s13 = smov %s943_s28  ;;  %18 = sbr.rel (!%p16_p7) target bundleno = 7 (0x7), region = 78 }
 0x295   :  { %324 = vsyncpa [#allocation3], 1 }
 0x296   :  { %326 = vsyncpa [#allocation3 + $0x1], 1 }
 0x297   :  { %327 = vsyncpa [#allocation6], 1 }
 0x298   :  { %328 = vsyncpa [#allocation4], 1 }
 0x299   :  { %330 = vsyncpa [#allocation4 + $0x1], 1 }

</bundles_post_ra>
